<compile_context>
chip_gen: v6e
topology: v6e:2x2x1
jax: 0.10.0
libtpu: 0.0.40
codegen_flags: <defaults>
</compile_context>

<pallas_src>
import jax
import jax.numpy as jnp
from jax.experimental import pallas as pl
from jax.experimental.pallas import tpu as pltpu


def _round_up(x, m):
    return ((x + m - 1) // m) * m


def _vmem_capacity_bytes():
    try:
        return int(pltpu.get_tpu_info().vmem_capacity_bytes)
    except Exception:
        return 64 << 20          # conservative fallback: v7x per-TensorCore VMEM


# ----------------------------- Pallas kernel -------------------------------

def _matmul_bias_silu_kernel(x_ref, w_ref, bias_ref, o_ref, acc_ref):
    # x_ref:    (tm, tk)  im2col patch rows (bf16)
    # w_ref:    (tk, tn)  flattened conv weight with BN scale folded in (bf16)
    # bias_ref: (1,  tn)  folded BN bias (beta - mean * scale), f32
    # o_ref:    (tm, tn)  output tile
    # acc_ref:  (tm, tn)  f32 accumulator scratch (resident across K steps)
    k = pl.program_id(2)

    @pl.when(k == 0)
    def _init():
        acc_ref[...] = jnp.zeros_like(acc_ref)

    acc_ref[...] += jnp.dot(x_ref[...], w_ref[...],
                            preferred_element_type=jnp.float32)

    @pl.when(k == pl.num_programs(2) - 1)
    def _finalize():
        y = acc_ref[...] + bias_ref[...]                 # BN scale already in w
        o_ref[...] = (y * jax.nn.sigmoid(y)).astype(o_ref.dtype)   # SiLU


def _matmul_bias_silu(x_mat, w_mat, bias, *, tm_max=None, tk_max=None,
                      compute_dtype=jnp.bfloat16, out_dtype=jnp.bfloat16):
    """x_mat: (M, K), w_mat: (K, C2) [BN-scaled], bias: (1, C2) -> (M, C2)."""
    M, K = x_mat.shape
    C2 = w_mat.shape[1]

    vmem_cap = _vmem_capacity_bytes()
    if tm_max is None:
        # 128 MiB parts (v5e/v6e) take the bigger row tile; v7x (64 MiB) -> 512.
        tm_max = 1024 if vmem_cap >= (96 << 20) else 512
    if tk_max is None:
        tk_max = 2048

    # Lane-dense, MXU-filling channel tile; usually a single j-block so the big
    # im2col matrix is streamed from HBM exactly once.
    tn = min(_round_up(C2, 128), 512)
    C2p = _round_up(C2, tn)

    # Row tile: multiple of 16 (bf16 packs [16,128] sublanes per vreg).
    tm = min(tm_max, _round_up(M, 16))
    Mp = _round_up(M, tm)

    # K tiling: full-depth single block when it fits (lane-padded to >=128),
    # otherwise pick tk to minimise zero padding rather than a blind round-up.
    if K <= 128:
        tk_eff = Kp = 128
    elif K <= tk_max:
        tk_eff = Kp = K
    else:
        nsteps = -(-K // tk_max)
        tk_eff = _round_up(-(-K // nsteps), 128)
        Kp = _round_up(K, tk_eff)

    xd = x_mat.astype(compute_dtype)
    wd = w_mat.astype(compute_dtype)
    if (Mp, Kp) != (M, K):
        xd = jnp.pad(xd, ((0, Mp - M), (0, Kp - K)))
    if (Kp, C2p) != (K, C2):
        wd = jnp.pad(wd, ((0, Kp - K), (0, C2p - C2)))
    b = bias.astype(jnp.float32)
    if C2p != C2:
        b = jnp.pad(b, ((0, 0), (0, C2p - C2)))

    grid = (Mp // tm, C2p // tn, Kp // tk_eff)

    out_bytes = jnp.dtype(out_dtype).itemsize
    # Double-buffered input/output tiles + resident f32 accumulator.
    footprint = (2 * (tm * tk_eff + tk_eff * tn) * 2      # bf16 x / w tiles
                 + 2 * tn * 4                             # bias tile (f32)
                 + 2 * tm * tn * out_bytes                # output tile
                 + tm * tn * 4)                           # accumulator
    vmem_cap_limit = max(32 << 20, min(vmem_cap - (16 << 20), 96 << 20))
    vmem_limit = int(min(vmem_cap_limit,
                         max(32 << 20, footprint + (8 << 20))))

    cost = pl.CostEstimate(
        flops=2 * Mp * Kp * C2p,
        transcendentals=Mp * C2p,                 # sigmoid in the epilogue
        bytes_accessed=(xd.size * xd.dtype.itemsize
                        + wd.size * wd.dtype.itemsize
                        + b.size * 4
                        + Mp * C2p * out_bytes))

    # NOTE: if profiling shows exposed DMA on small-K/small-C2 layers, add
    # pipeline_mode=pl.Buffered(3) to the x/w BlockSpecs and re-sweep.
    out = pl.pallas_call(
        _matmul_bias_silu_kernel,
        out_shape=jax.ShapeDtypeStruct((Mp, C2p), out_dtype),
        grid_spec=pltpu.PrefetchScalarGridSpec(
            num_scalar_prefetch=0,
            grid=grid,
            in_specs=[
                pl.BlockSpec((tm, tk_eff), lambda i, j, k: (i, k)),  # patch rows
                pl.BlockSpec((tk_eff, tn), lambda i, j, k: (k, j)),  # weight
                pl.BlockSpec((1, tn), lambda i, j, k: (0, j)),       # BN bias
            ],
            out_specs=pl.BlockSpec((tm, tn), lambda i, j, k: (i, j)),
            scratch_shapes=[pltpu.VMEM((tm, tn), jnp.float32)],
        ),
        compiler_params=pltpu.CompilerParams(
            dimension_semantics=("parallel", "parallel", "arbitrary"),
            vmem_limit_bytes=vmem_limit),
        cost_estimate=cost,
    )(xd, wd, b)
    return out[:M, :C2]


# ------------------------------ Conv module ---------------------------------

def autopad(k, p=None):
    if p is None:
        p = k // 2 if isinstance(k, int) else [x // 2 for x in k]
    return p


def _im2col_nhwc(x, k, s, p, dtype=jnp.bfloat16):
    """x: (N, C1, H, W) -> (N*Ho*Wo, k*k*C1) patch matrix.

    Casts to bf16 and transposes to NHWC on the 1x-sized input *before* the
    k^2 expansion, then builds patches by slicing/concatenating on the channel
    (lane) axis, so the expanded tensor is never transposed through HBM.
    K ordering is offset-major, channel-minor: K = (ki*k + kj)*C1 + c1.
    """
    # TODO(synk): fuse im2col into the Pallas kernel (k*k shifted matmuls over
    # an NHWC input with manual DMA) to avoid materializing the k^2-expanded
    # patch matrix through HBM at all.
    N, C1, H, W = x.shape
    Ho = (H + 2 * p - k) // s + 1
    Wo = (W + 2 * p - k) // s + 1
    xt = jnp.transpose(x, (0, 2, 3, 1)).astype(dtype)            # NHWC, bf16
    xp = jnp.pad(xt, ((0, 0), (p, p), (p, p), (0, 0)))
    patches = [xp[:, i:i + s * Ho:s, j:j + s * Wo:s, :]
               for i in range(k) for j in range(k)]
    cols = jnp.concatenate(patches, axis=-1)                     # (N,Ho,Wo,k*k*C1)
    return cols.reshape(N * Ho * Wo, k * k * C1), Ho, Wo


class ConvPallas:
    """Pallas equivalent of Conv(c1, c2, k, s, p, g=1, act=SiLU()), BN in eval mode."""

    def __init__(self, c1, c2, k=1, s=1, p=None, key=jax.random.PRNGKey(42),
                 out_dtype=jnp.bfloat16, channels_last=False,
                 tm_max=None, tk_max=None):
        # TODO(synk): grouped convolution (g > 1) not implemented; module default g=1.
        self.c1, self.c2, self.k, self.s = c1, c2, k, s
        self.p = autopad(k, p)
        self.out_dtype = out_dtype
        self.channels_last = channels_last
        self.tm_max, self.tk_max = tm_max, tk_max
        kw, kb, kg, km, kv = jax.random.split(key, 5)
        # Deterministic synthetic parameters (shapes match nn.Conv2d / nn.BatchNorm2d).
        self.weight = jax.random.normal(kw, (c2, c1, k, k), jnp.float32) * 0.1
        self.bn_gamma = 1.0 + 0.1 * jax.random.normal(kg, (c2,), jnp.float32)
        self.bn_beta = 0.1 * jax.random.normal(kb, (c2,), jnp.float32)
        self.bn_mean = 0.1 * jax.random.normal(km, (c2,), jnp.float32)
        self.bn_var = jnp.abs(jax.random.normal(kv, (c2,), jnp.float32)) + 0.5
        self.eps = 0.001

    def __call__(self, x):
        # x: (N, C1, H, W) -> (N, C2, Ho, Wo)  (or NHWC if channels_last=True)
        N = x.shape[0]
        x_mat, Ho, Wo = _im2col_nhwc(x, self.k, self.s, self.p)
        scale = self.bn_gamma / jnp.sqrt(self.bn_var + self.eps)            # (C2,)
        # Weight reordered to (ki, kj, c1, c2) to match the NHWC patch ordering;
        # BN scale folded into this tiny constant matrix at trace time.
        w_mat = jnp.transpose(self.weight, (2, 3, 1, 0)).reshape(
            self.k * self.k * self.c1, self.c2) * scale[None, :]            # (K, C2)
        bias = (self.bn_beta - self.bn_mean * scale).reshape(1, -1)          # (1, C2)
        y = _matmul_bias_silu(x_mat, w_mat, bias, tm_max=self.tm_max,
                              tk_max=self.tk_max, out_dtype=self.out_dtype)  # (M, C2)
        y = y.reshape(N, Ho, Wo, self.c2)
        if self.channels_last:
            return y                              # NHWC: saves one full HBM pass
        return y.transpose(0, 3, 1, 2)            # NCHW to match the PyTorch module

    def reference(self, x):
        """Pure-JAX reference for correctness checking (f32 throughout)."""
        y = jax.lax.conv_general_dilated(
            x, self.weight, window_strides=(self.s, self.s),
            padding=[(self.p, self.p), (self.p, self.p)],
            dimension_numbers=("NCHW", "OIHW", "NCHW"))
        scale = (self.bn_gamma / jnp.sqrt(self.bn_var + self.eps))[None, :, None, None]
        bias = (self.bn_beta - self.bn_mean * scale[0, :, 0, 0])[None, :, None, None]
        y = y * scale + bias
        return y * jax.nn.sigmoid(y)


# --------------------------------- main --------------------------------------

if __name__ == "__main__":
    key = jax.random.PRNGKey(0)

    # --- Test 1: module-default small shapes (single K block, no ragged pads) ---
    N, C1, H, W = 2, 4, 16, 16
    C2, K, S = 8, 3, 1
    x = jax.random.normal(key, (N, C1, H, W), jnp.float32)
    conv = ConvPallas(C1, C2, k=K, s=S, key=jax.random.PRNGKey(42))
    out = jax.block_until_ready(conv(x))
    ref = jax.block_until_ready(conv.reference(x))
    assert out.shape == ref.shape == (N, C2, H, W), (out.shape, ref.shape)
    err = float(jnp.max(jnp.abs(out.astype(jnp.float32) - ref)))
    assert jnp.allclose(out.astype(jnp.float32), ref, atol=5e-2, rtol=5e-2), err

    # --- Test 2: K-tiled accumulator path (K=144 > tk_max=128) + ragged M / C2 ---
    x2 = jax.random.normal(jax.random.PRNGKey(1), (2, 16, 9, 9), jnp.float32)
    conv2 = ConvPallas(16, 40, k=3, s=1, key=jax.random.PRNGKey(7), tk_max=128)
    out2 = jax.block_until_ready(conv2(x2))
    ref2 = jax.block_until_ready(conv2.reference(x2))
    assert out2.shape == ref2.shape == (2, 40, 9, 9), (out2.shape, ref2.shape)
    err2 = float(jnp.max(jnp.abs(out2.astype(jnp.float32) - ref2)))
    assert jnp.allclose(out2.astype(jnp.float32), ref2, atol=5e-2, rtol=5e-2), err2

    print("KERNEL_OK")
</pallas_src>

<mosaic_0001>
module attributes {stable_mosaic.version = 11 : i64} {
  func.func @_matmul_bias_silu_kernel(%arg0: i32, %arg1: i32, %arg2: i32, %arg3: memref<512x128xbf16, #tpu.memory_space<vmem>>, %arg4: memref<128x128xbf16, #tpu.memory_space<vmem>>, %arg5: memref<1x128xf32, #tpu.memory_space<vmem>>, %arg6: memref<512x128xbf16, #tpu.memory_space<vmem>>, %arg7: memref<512x128xf32, #tpu.memory_space<vmem>>) attributes {dimension_semantics = [#tpu.dimension_semantics<parallel>, #tpu.dimension_semantics<parallel>, #tpu.dimension_semantics<arbitrary>], iteration_bounds = array<i64: 1, 1, 1>, scalar_prefetch = 0 : i64, scratch_operands = 1 : i64, tpu.core_type = #tpu.core_type<tc>, window_params = [{transform_indices = @transform_0, window_bounds = array<i64: 512, 128>}, {transform_indices = @transform_1, window_bounds = array<i64: 128, 128>}, {transform_indices = @transform_2, window_bounds = array<i64: 1, 128>}, {transform_indices = @transform_3, window_bounds = array<i64: 512, 128>}]} {
    %c0_i32 = arith.constant 0 : i32
    %0 = arith.cmpi eq, %arg2, %c0_i32 : i32
    %1 = arith.extui %0 : i1 to i32
    %c0_i32_0 = arith.constant 0 : i32
    %2 = arith.cmpi ne, %1, %c0_i32_0 : i32
    scf.if %2 {
      %cst_10 = arith.constant 0.000000e+00 : f32
      %12 = vector.broadcast %cst_10 : f32 to vector<512x128xf32>
      %c0_11 = arith.constant 0 : index
      %c0_12 = arith.constant 0 : index
      %13 = vector.load %arg7[%c0_11, %c0_12] : memref<512x128xf32, #tpu.memory_space<vmem>>, vector<512x128xf32>
      tpu.vector_store %arg7[%c0_11, %c0_12], %12 {strides = array<i32>} : memref<512x128xf32, #tpu.memory_space<vmem>>, vector<512x128xf32>,
    } else {
    }
    %c0 = arith.constant 0 : index
    %c0_1 = arith.constant 0 : index
    %3 = vector.load %arg7[%c0, %c0_1] : memref<512x128xf32, #tpu.memory_space<vmem>>, vector<512x128xf32>
    %c0_2 = arith.constant 0 : index
    %c0_3 = arith.constant 0 : index
    %4 = vector.load %arg3[%c0_2, %c0_3] : memref<512x128xbf16, #tpu.memory_space<vmem>>, vector<512x128xbf16>
    %c0_4 = arith.constant 0 : index
    %c0_5 = arith.constant 0 : index
    %5 = vector.load %arg4[%c0_4, %c0_5] : memref<128x128xbf16, #tpu.memory_space<vmem>>, vector<128x128xbf16>
    %cst = arith.constant dense<0.000000e+00> : vector<512x128xf32>
    %6 = tpu.matmul %4, %5, %cst {dimension_numbers = #tpu.dot_dimension_numbers<[1], [0], [0], [1], [0, 0, 1, 1], [], []>} : vector<512x128xbf16>, vector<128x128xbf16>, vector<512x128xf32> -> vector<512x128xf32>
    %7 = arith.addf %3, %6 : vector<512x128xf32>
    %c0_6 = arith.constant 0 : index
    %c0_7 = arith.constant 0 : index
    %8 = vector.load %arg7[%c0_6, %c0_7] : memref<512x128xf32, #tpu.memory_space<vmem>>, vector<512x128xf32>
    tpu.vector_store %arg7[%c0_6, %c0_7], %7 {strides = array<i32>} : memref<512x128xf32, #tpu.memory_space<vmem>>, vector<512x128xf32>,
    %c0_i32_8 = arith.constant 0 : i32
    %9 = arith.cmpi eq, %arg2, %c0_i32_8 : i32
    %10 = arith.extui %9 : i1 to i32
    %c0_i32_9 = arith.constant 0 : i32
    %11 = arith.cmpi ne, %10, %c0_i32_9 : i32
    scf.if %11 {
      %c0_10 = arith.constant 0 : index
      %c0_11 = arith.constant 0 : index
      %12 = vector.load %arg7[%c0_10, %c0_11] : memref<512x128xf32, #tpu.memory_space<vmem>>, vector<512x128xf32>
      %c0_12 = arith.constant 0 : index
      %c0_13 = arith.constant 0 : index
      %13 = vector.load %arg5[%c0_12, %c0_13] : memref<1x128xf32, #tpu.memory_space<vmem>>, vector<1x128xf32>
      %14 = vector.broadcast %13 : vector<1x128xf32> to vector<512x128xf32>
      %15 = arith.addf %12, %14 : vector<512x128xf32>
      %16 = arith.negf %15 : vector<512x128xf32>
      %17 = math.exp %16 : vector<512x128xf32>
      %cst_14 = arith.constant 1.000000e+00 : f32
      %18 = vector.broadcast %cst_14 : f32 to vector<512x128xf32>
      %19 = arith.addf %18, %17 : vector<512x128xf32>
      %20 = arith.divf %18, %19 : vector<512x128xf32>
      %21 = arith.mulf %15, %20 : vector<512x128xf32>
      %22 = arith.truncf %21 : vector<512x128xf32> to vector<512x128xbf16>
      %c0_15 = arith.constant 0 : index
      %c0_16 = arith.constant 0 : index
      %23 = vector.load %arg6[%c0_15, %c0_16] : memref<512x128xbf16, #tpu.memory_space<vmem>>, vector<512x128xbf16>
      tpu.vector_store %arg6[%c0_15, %c0_16], %22 {strides = array<i32>} : memref<512x128xbf16, #tpu.memory_space<vmem>>, vector<512x128xbf16>,
    } else {
    }
    return
  }
  func.func @transform_0(%arg0: i32, %arg1: i32, %arg2: i32) -> (i32, i32) {
    %c0_i32 = arith.constant 0 : i32
    return %arg0, %arg2 : i32, i32
  }
  func.func @transform_1(%arg0: i32, %arg1: i32, %arg2: i32) -> (i32, i32) {
    %c0_i32 = arith.constant 0 : i32
    return %arg2, %arg1 : i32, i32
  }
  func.func @transform_2(%arg0: i32, %arg1: i32, %arg2: i32) -> (i32, i32) {
    %c0_i32 = arith.constant 0 : i32
    %c0_i32_0 = arith.constant 0 : i32
    return %c0_i32, %arg1 : i32, i32
  }
  func.func @transform_3(%arg0: i32, %arg1: i32, %arg2: i32) -> (i32, i32) {
    %c0_i32 = arith.constant 0 : i32
    return %arg0, %arg1 : i32, i32
  }
}

</mosaic_0001>

<bundles_post_ra>
// kernel: tpu_custom_call.1
= control target key start
LH: loop header
LB: loop body
LE: loop exit
PB: predicated region body
PF: predicated region fallthrough
CT: control target
= control target key end

     0   :  { %8 = vsyncpa [#allocation4], 0  ;;  %s3150_s0 = inlined_call_operand.hbm [shape: bf16[512,128], index: 0, kind: input, shape index: {}]   ;;  %s3151_s1 = inlined_call_operand.hbm [shape: bf16[128,128], index: 1, kind: input, shape index: {}]   ;;  %s3152_s2 = inlined_call_operand.vmem [shape: f32[1,128], index: 2, kind: input, shape index: {}]   ;;  %s3153_s3 = inlined_call_operand.hbm [shape: bf16[512,128], index: 3, kind: output, shape index: {}]  }
   0x1   :  { %9 = vsyncpa [#allocation7], 0 }
   0x2   :  { %10 = vsyncpa [#allocation5], 0  ;;  %s2764_s12 = smov [#allocation3]  }
   0x3   :  { %s16_s13 = sshll.u32 %s2764_s12, 4  ;;  %s17_s13 = int_to_ptr.vmem [resolvable:$true] %s16_s13 }
   0x4   :  { %s2706_s14 = scalar_lea.vmem %s17_s13, 4096  ;;  %p2711_p1 = scmp.lt.s32.totalorder %s17_s13, %s17_s13 }
   0x5   :  { %p2707_p0 = scmp.ne.s32.totalorder %s17_s13, %s2706_s14  ;;  %p2712_p2 = scmp.lt.s32.totalorder %s2706_s14, %s2706_s14 }
   0x7   :  { %p2713_p3 = por %p2712_p2, %p2711_p1 }
   0x9   :  { %p2714_p4 = pnand %p2713_p3, %p2707_p0 }
   0xb   :  { %2717 = shalt.err (!%p2714_p4)
}
   0xc   :  { %s2765_s15 = smov 64   ;;  %s2766_s16 = smov 4  }
   0xd   :  { %22 = dma.hbm_to_vmem [thread:$0]  %s3150_s0, 4096, %s17_s13, [#allocation4], %s2765_s15, %s2765_s15, %s2766_s16  }
   0xe   :  { %s2767_s19 = smov [#allocation6]  }
   0xf   :  { %s28_s20 = sshll.u32 %s2767_s19, 4  ;;  %s29_s20 = int_to_ptr.vmem [resolvable:$true] %s28_s20 }
  0x10   :  { %s2726_s21 = scalar_lea.vmem %s29_s20, 1024  ;;  %p2731_p6 = scmp.lt.s32.totalorder %s29_s20, %s29_s20 }
  0x11   :  { %p2727_p5 = scmp.ne.s32.totalorder %s29_s20, %s2726_s21  ;;  %p2732_p7 = scmp.lt.s32.totalorder %s2726_s21, %s2726_s21 }
  0x13   :  { %p2733_p8 = por %p2732_p7, %p2731_p6 }
  0x15   :  { %p2734_p9 = pnand %p2733_p8, %p2727_p5 }
  0x17   :  { %2737 = shalt.err (!%p2734_p9)
}
  0x18   :  { %34 = dma.hbm_to_vmem [thread:$0]  %s3151_s1, 1024, %s29_s20, [#allocation7], %s2765_s15, %s2765_s15, %s2766_s16  }
  0x19   :  { %2758 = dma.done.wait [#allocation4], 4096  }
  0x1a   :  { %2759 = vsyncadd [#allocation4], 4294963200 }
  0x1b   :  { %2760 = dma.done.wait [#allocation7], 1024  }
  0x1c   :  { %2761 = vsyncadd [#allocation7], 4294966272  ;;  %v2402_v0 = vld [vmem:[#allocation6 + $0x38] sm:$0xff]   ;;  %v2403_v1 = vld [vmem:[#allocation6 + $0x30] sm:$0xff]  }
  0x1d   :  { %2301 = vmatprep.subr.bf16.mxu0 %v2402_v0  ;;  %2381 = vmatprep.subr.bf16.mxu1 %v2402_v0  ;;  %v2404_v2 = vld [vmem:[#allocation6 + $0x28] sm:$0xff]   ;;  %v2405_v3 = vld [vmem:[#allocation6 + $0x20] sm:$0xff]   ;;  %v2406_v6 = vld [vmem:[#allocation6 + $0x18] sm:$0xff]  }
  0x1e   :  { %2302 = vmatpush3.bf16.msra.mxu0 %v2402_v0  ;;  %2389 = vmatpush3.bf16.msra.mxu1 %v2402_v0  ;;  %v2410_v4 = vld [vmem:[#allocation3] sm:$0xff]   ;;  %v2407_v7 = vld [vmem:[#allocation6 + $0x10] sm:$0xff]   ;;  %v2408_v8 = vld [vmem:[#allocation6 + $0x8] sm:$0xff]  }
  0x1f   :  { %2303 = vmatprep.subr.bf16.mxu0 %v2403_v1  ;;  %2382 = vmatprep.subr.bf16.mxu1 %v2403_v1  ;;  %v2411_v5 = vld [vmem:[#allocation3 + $0x80] sm:$0xff]   ;;  %v2412_v10 = vld [vmem:[#allocation3 + $0x8] sm:$0xff]   ;;  %v2414_v12 = vld [vmem:[#allocation3 + $0x10] sm:$0xff]  }
  0x20   :  { %2317 = vmatprep.mubr.bf16.mxu0 %v2410_v4  ;;  %2349 = vmatprep.mubr.bf16.mxu1 %v2411_v5  ;;  %v2409_v9 = vld [vmem:[#allocation6] sm:$0xff]   ;;  %v2413_v11 = vld [vmem:[#allocation3 + $0x88] sm:$0xff]   ;;  %v2415_v13 = vld [vmem:[#allocation3 + $0x90] sm:$0xff]  }
  0x21   :  { %v2416_v14 = vld [vmem:[#allocation3 + $0x18] sm:$0xff]   ;;  %v2418_v16 = vld [vmem:[#allocation3 + $0x20] sm:$0xff]   ;;  %v2420_v18 = vld [vmem:[#allocation3 + $0x28] sm:$0xff]  }
  0x22   :  { %2304 = vmatpush3.bf16.msra.mxu0 %v2403_v1  ;;  %2390 = vmatpush3.bf16.msra.mxu1 %v2403_v1  ;;  %v2417_v15 = vld [vmem:[#allocation3 + $0x98] sm:$0xff]   ;;  %v2419_v17 = vld [vmem:[#allocation3 + $0xa0] sm:$0xff]   ;;  %v2421_v19 = vld [vmem:[#allocation3 + $0xa8] sm:$0xff]  }
  0x23   :  { %2305 = vmatprep.subr.bf16.mxu0 %v2404_v2  ;;  %2383 = vmatprep.subr.bf16.mxu1 %v2404_v2  ;;  %v2422_v20 = vld [vmem:[#allocation3 + $0x30] sm:$0xff]   ;;  %v2424_v22 = vld [vmem:[#allocation3 + $0x38] sm:$0xff]   ;;  %v2426_v24 = vld [vmem:[#allocation3 + $0x40] sm:$0xff]  }
  0x24   :  { %v2423_v21 = vld [vmem:[#allocation3 + $0xb0] sm:$0xff]   ;;  %v2425_v23 = vld [vmem:[#allocation3 + $0xb8] sm:$0xff]   ;;  %v2427_v25 = vld [vmem:[#allocation3 + $0xc0] sm:$0xff]  }
  0x25   :  { %v2428_v26 = vld [vmem:[#allocation3 + $0x48] sm:$0xff]   ;;  %v2430_v28 = vld [vmem:[#allocation3 + $0x50] sm:$0xff]   ;;  %v2432_v30 = vld [vmem:[#allocation3 + $0x58] sm:$0xff]  }
  0x26   :  { %2306 = vmatpush3.bf16.msra.mxu0 %v2404_v2  ;;  %2391 = vmatpush3.bf16.msra.mxu1 %v2404_v2  ;;  %v2429_v27 = vld [vmem:[#allocation3 + $0xc8] sm:$0xff]   ;;  %v2431_v29 = vld [vmem:[#allocation3 + $0xd0] sm:$0xff]   ;;  %v2433_v31 = vld [vmem:[#allocation3 + $0xd8] sm:$0xff]  }
  0x27   :  { %2307 = vmatprep.subr.bf16.mxu0 %v2405_v3  ;;  %2384 = vmatprep.subr.bf16.mxu1 %v2405_v3  ;;  %v2434_v32 = vld [vmem:[#allocation3 + $0x60] sm:$0xff]   ;;  %v2436_v34 = vld [vmem:[#allocation3 + $0x68] sm:$0xff]   ;;  %v2438_v36 = vld [vmem:[#allocation3 + $0x70] sm:$0xff]  }
  0x28   :  { %v2435_v33 = vld [vmem:[#allocation3 + $0xe0] sm:$0xff]   ;;  %v2437_v35 = vld [vmem:[#allocation3 + $0xe8] sm:$0xff]   ;;  %v2439_v37 = vld [vmem:[#allocation3 + $0xf0] sm:$0xff]  }
  0x29   :  { %v2440_v38 = vld [vmem:[#allocation3 + $0x78] sm:$0xff]   ;;  %v2804_v40 = vld [vmem:[%s3152_s2] ss:$0 sm:$0xff]  ;;  %s2768_s2 = smov [#allocation8]  }
  0x2a   :  { %2308 = vmatpush3.bf16.msra.mxu0 %v2405_v3  ;;  %2392 = vmatpush3.bf16.msra.mxu1 %v2405_v3  ;;  %v2441_v39 = vld [vmem:[#allocation3 + $0xf8] sm:$0xff]   ;;  %s1824_s24 = sshll.u32 %s2768_s2, 4  ;;  %s1825_s24 = int_to_ptr.vmem [resolvable:$true] %s1824_s24 }
  0x2b   :  { %2309 = vmatprep.subr.bf16.mxu0 %v2406_v6  ;;  %2385 = vmatprep.subr.bf16.mxu1 %v2406_v6  ;;  %s2738_s25 = scalar_lea.vmem %s1825_s24, 4096  ;;  %p2743_p11 = scmp.lt.s32.totalorder %s1825_s24, %s1825_s24 }
  0x2c   :  { %p2739_p10 = scmp.ne.s32.totalorder %s1825_s24, %s2738_s25  ;;  %p2744_p12 = scmp.lt.s32.totalorder %s2738_s25, %s2738_s25 }
  0x2e   :  { %2310 = vmatpush3.bf16.msra.mxu0 %v2406_v6  ;;  %2393 = vmatpush3.bf16.msra.mxu1 %v2406_v6  ;;  %p2745_p13 = por %p2744_p12, %p2743_p11 }
  0x2f   :  { %2311 = vmatprep.subr.bf16.mxu0 %v2407_v7  ;;  %2386 = vmatprep.subr.bf16.mxu1 %v2407_v7 }
  0x30   :  { %p2746_p0 = pnand %p2745_p13, %p2739_p10 }
  0x32   :  { %2312 = vmatpush3.bf16.msra.mxu0 %v2407_v7  ;;  %2394 = vmatpush3.bf16.msra.mxu1 %v2407_v7 }
  0x33   :  { %2313 = vmatprep.subr.bf16.mxu0 %v2408_v8  ;;  %2387 = vmatprep.subr.bf16.mxu1 %v2408_v8 }
  0x36   :  { %2314 = vmatpush3.bf16.msra.mxu0 %v2408_v8  ;;  %2395 = vmatpush3.bf16.msra.mxu1 %v2408_v8 }
  0x37   :  { %2315 = vmatprep.subr.bf16.mxu0 %v2409_v9  ;;  %2388 = vmatprep.subr.bf16.mxu1 %v2409_v9 }
  0x3a   :  { %2316 = vmatpush3.bf16.msra.mxu0 %v2409_v9  ;;  %2396 = vmatpush3.bf16.msra.mxu1 %v2409_v9 }
  0x3d   :  { %2318 = vmatmul.mubr.bf16.vlgmr.msra.gmra.mxu0 %v2412_v10  ;;  %2350 = vmatmul.mubr.bf16.vlgmr.msra.gmra.mxu1 %v2413_v11 }
  0x3e   :  { %2321 = vmatprep.mubr.bf16.mxu0 %v2414_v12  ;;  %2353 = vmatprep.mubr.bf16.mxu1 %v2415_v13 }
  0x45   :  { %2322 = vmatmul.mubr.bf16.gmra.mxu0 %v2416_v14  ;;  %2354 = vmatmul.mubr.bf16.gmra.mxu1 %v2417_v15 }
  0x46   :  { %2325 = vmatprep.mubr.bf16.mxu0 %v2418_v16  ;;  %2357 = vmatprep.mubr.bf16.mxu1 %v2419_v17 }
  0x4d   :  { %2326 = vmatmul.mubr.bf16.gmra.mxu0 %v2420_v18  ;;  %2358 = vmatmul.mubr.bf16.gmra.mxu1 %v2421_v19 }
  0x4e   :  { %2329 = vmatprep.mubr.bf16.mxu0 %v2422_v20  ;;  %2361 = vmatprep.mubr.bf16.mxu1 %v2423_v21 }
  0x55   :  { %2330 = vmatmul.mubr.bf16.gmra.mxu0 %v2424_v22  ;;  %2362 = vmatmul.mubr.bf16.gmra.mxu1 %v2425_v23 }
  0x56   :  { %2333 = vmatprep.mubr.bf16.mxu0 %v2426_v24  ;;  %2365 = vmatprep.mubr.bf16.mxu1 %v2427_v25 }
  0x5d   :  { %2334 = vmatmul.mubr.bf16.gmra.mxu0 %v2428_v26  ;;  %2366 = vmatmul.mubr.bf16.gmra.mxu1 %v2429_v27 }
  0x5e   :  { %2337 = vmatprep.mubr.bf16.mxu0 %v2430_v28  ;;  %2369 = vmatprep.mubr.bf16.mxu1 %v2431_v29 }
  0x65   :  { %2338 = vmatmul.mubr.bf16.gmra.mxu0 %v2432_v30  ;;  %2370 = vmatmul.mubr.bf16.gmra.mxu1 %v2433_v31 }
  0x66   :  { %2341 = vmatprep.mubr.bf16.mxu0 %v2434_v32  ;;  %2373 = vmatprep.mubr.bf16.mxu1 %v2435_v33 }
  0x6d   :  { %2342 = vmatmul.mubr.bf16.gmra.mxu0 %v2436_v34  ;;  %2374 = vmatmul.mubr.bf16.gmra.mxu1 %v2437_v35 }
  0x6e   :  { %2345 = vmatprep.mubr.bf16.mxu0 %v2438_v36  ;;  %2377 = vmatprep.mubr.bf16.mxu1 %v2439_v37 }
  0x75   :  { %2346 = vmatmul.mubr.bf16.gmra.mxu0 %v2440_v38  ;;  %2378 = vmatmul.mubr.bf16.gmra.mxu1 %v2441_v39 }
  0xfd   :  { %v2319_v41 = vpop.f32.mrf.mxu0  ;;  %v2351_v42 = vpop.f32.mrf.mxu1 }
  0xfe   :  { %v2807_v43 = vadd.f32 %v2319_v41, %v2804_v40  ;;  %v2810_v44 = vadd.f32 %v2351_v42, %v2804_v40 }
  0xff   :  { %v530_v45 = vpop.f32.mrf.mxu0  ;;  %v658_v46 = vpop.f32.mrf.mxu1 }
 0x100   :  { %v1880_v47 = vmul.f32 -1.442695, %v2807_v43  ;;  %v1912_v48 = vmul.f32 -1.442695, %v2810_v44  ;;  %v2815_v49 = vadd.f32 %v2804_v40, %v530_v45  ;;  %v2818_v50 = vadd.f32 %v2804_v40, %v658_v46 }
 0x101   :  { %v2320_v51 = vpop.f32.mrf.mxu0  ;;  %v2352_v52 = vpop.f32.mrf.mxu1 }
 0x102   :  { %2442 = vpow2.f32 %v1880_v47  ;;  %v1878_v53 = vmul.f32 -1.442695, %v2815_v49  ;;  %v1910_v54 = vmul.f32 -1.442695, %v2818_v50  ;;  %v2823_v55 = vadd.f32 %v2320_v51, %v2804_v40 }
 0x103   :  { %2444 = vpow2.f32 %v1912_v48  ;;  %v2826_v56 = vadd.f32 %v2352_v52, %v2804_v40  ;;  %v533_v57 = vpop.f32.mrf.mxu0  ;;  %v661_v58 = vpop.f32.mrf.mxu1 }
 0x104   :  { %2446 = vpow2.f32 %v1878_v53  ;;  %v1881_v59 = vmul.f32 -1.442695, %v2823_v55  ;;  %v2830_v60 = vadd.f32 %v2804_v40, %v533_v57  ;;  %v2833_v61 = vadd.f32 %v2804_v40, %v661_v58 }
 0x105   :  { %2448 = vpow2.f32 %v1910_v54  ;;  %v1913_v62 = vmul.f32 -1.442695, %v2826_v56  ;;  %v2323_v63 = vpop.f32.mrf.mxu0  ;;  %v2355_v0 = vpop.f32.mrf.mxu1 }
 0x106   :  { %2450 = vpow2.f32 %v1881_v59  ;;  %v1879_v1 = vmul.f32 -1.442695, %v2830_v60  ;;  %v1911_v2 = vmul.f32 -1.442695, %v2833_v61  ;;  %v2839_v3 = vadd.f32 %v2323_v63, %v2804_v40 }
 0x107   :  { %2452 = vpow2.f32 %v1913_v62  ;;  %v2842_v4 = vadd.f32 %v2355_v0, %v2804_v40  ;;  %v546_v5 = vpop.f32.mrf.mxu0  ;;  %v674_v6 = vpop.f32.mrf.mxu1 }
 0x108   :  { %2454 = vpow2.f32 %v1879_v1  ;;  %v1884_v7 = vmul.f32 -1.442695, %v2839_v3  ;;  %v2846_v8 = vadd.f32 %v2804_v40, %v546_v5  ;;  %v2849_v9 = vadd.f32 %v2804_v40, %v674_v6 }
 0x109   :  { %2456 = vpow2.f32 %v1911_v2  ;;  %v1916_v10 = vmul.f32 -1.442695, %v2842_v4  ;;  %v2324_v11 = vpop.f32.mrf.mxu0  ;;  %v2356_v12 = vpop.f32.mrf.mxu1 }
 0x10a   :  { %2458 = vpow2.f32 %v1884_v7  ;;  %v1882_v13 = vmul.f32 -1.442695, %v2846_v8  ;;  %v1914_v14 = vmul.f32 -1.442695, %v2849_v9  ;;  %v2855_v15 = vadd.f32 %v2324_v11, %v2804_v40 }
 0x10b   :  { %2460 = vpow2.f32 %v1916_v10  ;;  %v2858_v16 = vadd.f32 %v2356_v12, %v2804_v40  ;;  %v549_v17 = vpop.f32.mrf.mxu0  ;;  %v677_v18 = vpop.f32.mrf.mxu1 }
 0x10c   :  { %2462 = vpow2.f32 %v1882_v13  ;;  %v1885_v19 = vmul.f32 -1.442695, %v2855_v15  ;;  %v2862_v20 = vadd.f32 %v2804_v40, %v549_v17  ;;  %v2865_v21 = vadd.f32 %v2804_v40, %v677_v18 }
 0x10d   :  { %2464 = vpow2.f32 %v1914_v14  ;;  %v1917_v22 = vmul.f32 -1.442695, %v2858_v16  ;;  %v2327_v23 = vpop.f32.mrf.mxu0  ;;  %v2359_v24 = vpop.f32.mrf.mxu1 }
 0x10e   :  { %2466 = vpow2.f32 %v1885_v19  ;;  %v1883_v25 = vmul.f32 -1.442695, %v2862_v20  ;;  %v1915_v26 = vmul.f32 -1.442695, %v2865_v21  ;;  %v2871_v57 = vadd.f32 %v2327_v23, %v2804_v40 }
 0x10f   :  { %v2443_v27 = vpop.eup %2442  ;;  %2468 = vpow2.f32 %v1917_v22  ;;  %v562_v28 = vpop.f32.mrf.mxu0  ;;  %v2874_v5 = vadd.f32 %v2359_v24, %v2804_v40 }
 0x110   :  { %v690_v29 = vpop.f32.mrf.mxu1  ;;  %v2445_v30 = vpop.eup %2444  ;;  %v1245_v31 = vadd.f32 1.0, %v2443_v27  ;;  %2470 = vpow2.f32 %v1883_v25  ;;  %v1888_v11 = vmul.f32 -1.442695, %v2871_v57  ;;  %v2878_v12 = vadd.f32 %v2804_v40, %v562_v28 }
 0x111   :  { %v2447_v32 = vpop.eup %2446  ;;  %v1277_v33 = vadd.f32 1.0, %v2445_v30  ;;  %2472 = vpow2.f32 %v1915_v26  ;;  %v2328_v34 = vpop.f32.mrf.mxu0  ;;  %v2881_v17 = vadd.f32 %v2804_v40, %v690_v29 }
 0x112   :  { %v2449_v35 = vpop.eup %2448  ;;  %2474 = vrcp.f32 %v1245_v31  ;;  %v1243_v36 = vadd.f32 1.0, %v2447_v32  ;;  %v2360_v37 = vpop.f32.mrf.mxu1  ;;  %v2884_v18 = vadd.f32 %v2328_v34, %v2804_v40 }
 0x113   :  { %v2451_v38 = vpop.eup %2450  ;;  %2476 = vrcp.f32 %v1277_v33  ;;  %v1275_v39 = vadd.f32 1.0, %v2449_v35  ;;  %v565_v47 = vpop.f32.mrf.mxu0  ;;  %v2887_v23 = vadd.f32 %v2360_v37, %v2804_v40  ;;  %v1920_v33 = vmul.f32 -1.442695, %v2874_v5 }
 0x114   :  { %v2453_v41 = vpop.eup %2452  ;;  %2478 = vrcp.f32 %v1243_v36  ;;  %v1246_v42 = vadd.f32 1.0, %v2451_v38  ;;  %v693_v52 = vpop.f32.mrf.mxu1  ;;  %v2890_v24 = vadd.f32 %v2804_v40, %v565_v47  ;;  %v1886_v36 = vmul.f32 -1.442695, %v2878_v12 }
 0x115   :  { %v2455_v45 = vpop.eup %2454  ;;  %2480 = vrcp.f32 %v1275_v39  ;;  %v1278_v46 = vadd.f32 1.0, %v2453_v41  ;;  %v2331_v0 = vpop.f32.mrf.mxu0  ;;  %v2893_v28 = vadd.f32 %v2804_v40, %v693_v52  ;;  %v1918_v38 = vmul.f32 -1.442695, %v2881_v17 }
 0x116   :  { %v2457_v48 = vpop.eup %2456  ;;  %2482 = vrcp.f32 %v1246_v42  ;;  %v1244_v51 = vadd.f32 1.0, %v2455_v45  ;;  %v2363_v6 = vpop.f32.mrf.mxu1  ;;  %v2896_v29 = vadd.f32 %v2331_v0, %v2804_v40  ;;  %v1889_v39 = vmul.f32 -1.442695, %v2884_v18 }
 0x117   :  { %v2459_v53 = vpop.eup %2458  ;;  %2484 = vrcp.f32 %v1278_v46  ;;  %v1276_v54 = vadd.f32 1.0, %v2457_v48  ;;  %v578_v25 = vpop.f32.mrf.mxu0  ;;  %v2900_v34 = vadd.f32 %v2363_v6, %v2804_v40  ;;  %v1921_v41 = vmul.f32 -1.442695, %v2887_v23 }
 0x118   :  { %v2461_v58 = vpop.eup %2460  ;;  %2486 = vrcp.f32 %v1244_v51  ;;  %v1249_v59 = vadd.f32 1.0, %v2459_v53  ;;  %v706_v30 = vpop.f32.mrf.mxu1  ;;  %v1887_v46 = vmul.f32 -1.442695, %v2890_v24  ;;  %v1919_v47 = vmul.f32 -1.442695, %v2893_v28 }
 0x119   :  { %v2463_v62 = vpop.eup %2462  ;;  %2488 = vrcp.f32 %v1276_v54  ;;  %v1281_v63 = vadd.f32 1.0, %v2461_v58  ;;  %v2332_v42 = vpop.f32.mrf.mxu0  ;;  %v1892_v48 = vmul.f32 -1.442695, %v2896_v29  ;;  %v1924_v53 = vmul.f32 -1.442695, %v2900_v34 }
 0x11a   :  { %v2465_v1 = vpop.eup %2464  ;;  %2490 = vrcp.f32 %v1249_v59  ;;  %v1247_v2 = vadd.f32 1.0, %v2463_v62  ;;  %v2364_v51 = vpop.f32.mrf.mxu1  ;;  %v2911_v54 = vadd.f32 %v2804_v40, %v578_v25  ;;  %v2914_v58 = vadd.f32 %v2804_v40, %v706_v30 }
 0x11b   :  { %v2467_v7 = vpop.eup %2466  ;;  %2492 = vrcp.f32 %v1281_v63  ;;  %v1279_v10 = vadd.f32 1.0, %v2465_v1  ;;  %v2919_v0 = vadd.f32 %v2332_v42, %v2804_v40 }
 0x11c   :  { %v2469_v13 = vpop.eup %2468  ;;  %2494 = vrcp.f32 %v1247_v2  ;;  %v1250_v14 = vadd.f32 1.0, %v2467_v7  ;;  %v2924_v7 = vadd.f32 %v2364_v51, %v2804_v40 }
 0x11d   :  { %v2471_v19 = vpop.eup %2470  ;;  %2496 = vrcp.f32 %v1279_v10  ;;  %v1282_v22 = vadd.f32 1.0, %v2469_v13  ;;  %v581_v10 = vpop.f32.mrf.mxu0 }
 0x11e   :  { %v2473_v26 = vpop.eup %2472  ;;  %2498 = vrcp.f32 %v1250_v14  ;;  %v1248_v27 = vadd.f32 1.0, %v2471_v19  ;;  %v709_v14 = vpop.f32.mrf.mxu1 }
 0x11f   :  { %v2475_v31 = vpop.eup %2474  ;;  %2500 = vrcp.f32 %v1282_v22  ;;  %v1280_v32 = vadd.f32 1.0, %v2473_v26 }
 0x120   :  { %v2477_v35 = vpop.eup %2476  ;;  %2502 = vrcp.f32 %v1248_v27  ;;  %v1437_v62 = vmul.f32 %v2475_v31, %v2807_v43  ;;  %v1890_v27 = vmul.f32 -1.442695, %v2911_v54  ;;  %v1922_v31 = vmul.f32 -1.442695, %v2914_v58 }
 0x121   :  { %v2479_v37 = vpop.eup %2478  ;;  %2504 = vrcp.f32 %v1280_v32  ;;  %v1469_v2 = vmul.f32 %v2477_v35, %v2810_v44  ;;  %v2941_v35 = vpop.f32.mrf.mxu1 }
 0x122   :  { %v2481_v45 = vpop.eup %2480  ;;  %2506 = vpow2.f32 %v1888_v11  ;;  %v1435_v13 = vmul.f32 %v2479_v37, %v2815_v49  ;;  %v2932_v49 = vadd.f32 %v2804_v40, %v581_v10  ;;  %v1925_v37 = vmul.f32 -1.442695, %v2924_v7 }
 0x123   :  { %v2483_v52 = vpop.eup %2482  ;;  %2508 = vpow2.f32 %v1920_v33  ;;  %v1467_v22 = vmul.f32 %v2481_v45, %v2818_v50  ;;  %v2936_v50 = vadd.f32 %v2804_v40, %v709_v14  ;;  %v1893_v33 = vmul.f32 -1.442695, %v2919_v0 }
 0x124   :  { %v2485_v59 = vpop.eup %2484  ;;  %v1438_v63 = vmul.f32 %v2483_v52, %v2823_v55  ;;  %2510 = vpow2.f32 %v1886_v36  ;;  %v1891_v42 = vmul.f32 -1.442695, %v2932_v49 }
 0x125   :  { %v2487_v1 = vpop.eup %2486  ;;  %v1470_v6 = vmul.f32 %v2485_v59, %v2826_v56  ;;  %2512 = vpow2.f32 %v1918_v38 }
 0x126   :  { %v2489_v11 = vpop.eup %2488  ;;  %v2078_v43 = vpack.c.bf16 %v1438_v63, %v1437_v62  ;;  %v1436_v55 = vmul.f32 %v2487_v1, %v2830_v60  ;;  %2514 = vpow2.f32 %v1889_v39 }
 0x127   :  { %v2491_v19 = vpop.eup %2490  ;;  %v2158_v25 = vpack.c.bf16 %v1470_v6, %v1469_v2  ;;  %v1468_v44 = vmul.f32 %v2489_v11, %v2833_v61  ;;  %2516 = vpow2.f32 %v1921_v41  ;;  %v2938_v61 = vpop.f32.mrf.mxu0 }
 0x128   :  { %v2493_v56 = vpop.eup %2492  ;;  %2230 = vst [vmem:[#allocation8 + $0x8] sm:$0xff] %v2078_v43   ;;  %v2073_v26 = vpack.c.bf16 %v1436_v55, %v1435_v13  ;;  %2518 = vpow2.f32 %v1887_v46  ;;  %v1441_v39 = vmul.f32 %v2491_v19, %v2839_v3 }
 0x129   :  { %v2495_v30 = vpop.eup %2494  ;;  %2246 = vst [vmem:[#allocation8 + $0x88] sm:$0xff] %v2158_v25   ;;  %v2153_v60 = vpack.c.bf16 %v1468_v44, %v1467_v22  ;;  %2520 = vpow2.f32 %v1919_v47  ;;  %v1473_v46 = vmul.f32 %v2493_v56, %v2842_v4  ;;  %v2950_v51 = vpop.f32.mrf.mxu0 }
 0x12a   :  { %v2497_v32 = vpop.eup %2496  ;;  %2074 = vst [vmem:[#allocation8] sm:$0xff] %v2073_v26   ;;  %2522 = vpow2.f32 %v1892_v48  ;;  %v1923_v48 = vmul.f32 -1.442695, %v2936_v50 }
 0x12b   :  { %v2499_v36 = vpop.eup %2498  ;;  %2245 = vst [vmem:[#allocation8 + $0x80] sm:$0xff] %v2153_v60   ;;  %2524 = vpow2.f32 %v1924_v53  ;;  %v1439_v53 = vmul.f32 %v2495_v30, %v2846_v8  ;;  %v1471_v63 = vmul.f32 %v2497_v32, %v2849_v9 }
 0x12c   :  { %v2501_v38 = vpop.eup %2500  ;;  %v1442_v41 = vmul.f32 %v2499_v36, %v2855_v15  ;;  %2526 = vpow2.f32 %v1890_v27  ;;  %v722_v15 = vpop.f32.mrf.mxu1 }
 0x12d   :  { %v2503_v45 = vpop.eup %2502  ;;  %v1474_v47 = vmul.f32 %v2501_v38, %v2858_v16  ;;  %2528 = vpow2.f32 %v1922_v31  ;;  %v2958_v31 = vadd.f32 %v2938_v61, %v2804_v40 }
 0x12e   :  { %v2505_v52 = vpop.eup %2504  ;;  %v2088_v59 = vpack.c.bf16 %v1442_v41, %v1441_v39  ;;  %v1440_v3 = vmul.f32 %v2503_v45, %v2862_v20  ;;  %2530 = vpow2.f32 %v1893_v33  ;;  %v2336_v20 = vpop.f32.mrf.mxu0 }
 0x12f   :  { %v2507_v62 = vpop.eup %2506  ;;  %v2168_v1 = vpack.c.bf16 %v1474_v47, %v1473_v46  ;;  %v1472_v4 = vmul.f32 %v2505_v52, %v2865_v21  ;;  %2532 = vpow2.f32 %v1925_v37  ;;  %v2368_v9 = vpop.f32.mrf.mxu1  ;;  %v1896_v61 = vmul.f32 -1.442695, %v2958_v31 }
 0x130   :  { %v2509_v16 = vpop.eup %2508  ;;  %2232 = vst [vmem:[#allocation8 + $0x18] sm:$0xff] %v2088_v59   ;;  %v2083_v2 = vpack.c.bf16 %v1440_v3, %v1439_v53  ;;  %v1253_v6 = vadd.f32 1.0, %v2507_v62  ;;  %2534 = vpow2.f32 %v1891_v42  ;;  %v597_v44 = vpop.f32.mrf.mxu0  ;;  %v2962_v42 = vadd.f32 %v2941_v35, %v2804_v40 }
 0x131   :  { %v2511_v10 = vpop.eup %2510  ;;  %2248 = vst [vmem:[#allocation8 + $0x98] sm:$0xff] %v2168_v1   ;;  %v2163_v8 = vpack.c.bf16 %v1472_v4, %v1471_v63  ;;  %v1285_v11 = vadd.f32 1.0, %v2509_v16  ;;  %2536 = vpow2.f32 %v1923_v48  ;;  %v725_v27 = vpop.f32.mrf.mxu1  ;;  %v2967_v48 = vadd.f32 %v2804_v40, %v2950_v51 }
 0x132   :  { %v2513_v13 = vpop.eup %2512  ;;  %2231 = vst [vmem:[#allocation8 + $0x10] sm:$0xff] %v2083_v2   ;;  %2538 = vrcp.f32 %v1253_v6  ;;  %v1251_v43 = vadd.f32 1.0, %v2511_v10  ;;  %v2339_v38 = vpop.f32.mrf.mxu0  ;;  %v2970_v59 = vadd.f32 %v2804_v40, %v722_v15  ;;  %v2973_v3 = vadd.f32 %v2336_v20, %v2804_v40 }
 0x133   :  { %v2515_v55 = vpop.eup %2514  ;;  %2247 = vst [vmem:[#allocation8 + $0x90] sm:$0xff] %v2163_v8   ;;  %2540 = vrcp.f32 %v1285_v11  ;;  %v1283_v21 = vadd.f32 1.0, %v2513_v13  ;;  %v2371_v45 = vpop.f32.mrf.mxu1  ;;  %v2976_v63 = vadd.f32 %v2368_v9, %v2804_v40  ;;  %v2979_v1 = vadd.f32 %v2804_v40, %v597_v44 }
 0x134   :  { %v2517_v14 = vpop.eup %2516  ;;  %2542 = vrcp.f32 %v1251_v43  ;;  %v1254_v19 = vadd.f32 1.0, %v2515_v55  ;;  %v610_v51 = vpop.f32.mrf.mxu0  ;;  %v2982_v2 = vadd.f32 %v2804_v40, %v725_v27  ;;  %v2985_v15 = vadd.f32 %v2339_v38, %v2804_v40 }
 0x135   :  { %v2519_v22 = vpop.eup %2518  ;;  %2544 = vrcp.f32 %v1283_v21  ;;  %v1286_v25 = vadd.f32 1.0, %v2517_v14  ;;  %v738_v6 = vpop.f32.mrf.mxu1  ;;  %v1928_v11 = vmul.f32 -1.442695, %v2962_v42  ;;  %v2989_v20 = vadd.f32 %v2371_v45, %v2804_v40 }
 0x136   :  { %v2521_v56 = vpop.eup %2520  ;;  %2546 = vrcp.f32 %v1254_v19  ;;  %v1252_v26 = vadd.f32 1.0, %v2519_v22  ;;  %v1894_v43 = vmul.f32 -1.442695, %v2967_v48  ;;  %v1926_v55 = vmul.f32 -1.442695, %v2970_v59  ;;  %v2340_v19 = vpop.f32.mrf.mxu0 }
 0x137   :  { %v2523_v30 = vpop.eup %2522  ;;  %2548 = vrcp.f32 %v1286_v25  ;;  %v1284_v60 = vadd.f32 1.0, %v2521_v56  ;;  %v1897_v21 = vmul.f32 -1.442695, %v2973_v3  ;;  %v1929_v14 = vmul.f32 -1.442695, %v2976_v63 }
 0x138   :  { %v2525_v32 = vpop.eup %2524  ;;  %2550 = vrcp.f32 %v1252_v26  ;;  %v1257_v33 = vadd.f32 1.0, %v2523_v30  ;;  %v1895_v25 = vmul.f32 -1.442695, %v2979_v1  ;;  %v1927_v44 = vmul.f32 -1.442695, %v2982_v2  ;;  %v2372_v26 = vpop.f32.mrf.mxu1 }
 0x139   :  { %v2527_v36 = vpop.eup %2526  ;;  %2552 = vrcp.f32 %v1284_v60  ;;  %v1289_v37 = vadd.f32 1.0, %v2525_v32  ;;  %v1900_v56 = vmul.f32 -1.442695, %v2985_v15  ;;  %v1932_v30 = vmul.f32 -1.442695, %v2989_v20 }
 0x13a   :  { %v2529_v39 = vpop.eup %2528  ;;  %2554 = vrcp.f32 %v1257_v33  ;;  %v1255_v41 = vadd.f32 1.0, %v2527_v36  ;;  %v3000_v60 = vadd.f32 %v2804_v40, %v610_v51  ;;  %v3003_v32 = vadd.f32 %v2804_v40, %v738_v6 }
 0x13b   :  { %v2531_v46 = vpop.eup %2530  ;;  %2556 = vrcp.f32 %v1289_v37  ;;  %v1287_v47 = vadd.f32 1.0, %v2529_v39  ;;  %v3008_v38 = vadd.f32 %v2340_v19, %v2804_v40 }
 0x13c   :  { %v2533_v52 = vpop.eup %2532  ;;  %2558 = vrcp.f32 %v1255_v41  ;;  %v1258_v53 = vadd.f32 1.0, %v2531_v46  ;;  %v3013_v46 = vadd.f32 %v2372_v26, %v2804_v40 }
 0x13d   :  { %v2535_v35 = vpop.eup %2534  ;;  %2560 = vrcp.f32 %v1287_v47  ;;  %v1290_v62 = vadd.f32 1.0, %v2533_v52  ;;  %v613_v47 = vpop.f32.mrf.mxu0 }
 0x13e   :  { %v2537_v4 = vpop.eup %2536  ;;  %2562 = vrcp.f32 %v1258_v53  ;;  %v1256_v16 = vadd.f32 1.0, %v2535_v35  ;;  %v741_v53 = vpop.f32.mrf.mxu1 }
 0x13f   :  { %v2539_v10 = vpop.eup %2538  ;;  %2564 = vrcp.f32 %v1290_v62  ;;  %v1288_v8 = vadd.f32 1.0, %v2537_v4 }
 0x140   :  { %v2541_v13 = vpop.eup %2540  ;;  %2566 = vrcp.f32 %v1256_v16  ;;  %v1445_v36 = vmul.f32 %v2539_v10, %v2871_v57  ;;  %v1898_v16 = vmul.f32 -1.442695, %v3000_v60  ;;  %v1930_v10 = vmul.f32 -1.442695, %v3003_v32 }
 0x141   :  { %v2543_v9 = vpop.eup %2542  ;;  %2568 = vrcp.f32 %v1288_v8  ;;  %v1477_v41 = vmul.f32 %v2541_v13, %v2874_v5  ;;  %v3030_v13 = vpop.f32.mrf.mxu1 }
 0x142   :  { %v2545_v22 = vpop.eup %2544  ;;  %2570 = vpow2.f32 %v1896_v61  ;;  %v1443_v52 = vmul.f32 %v2543_v9, %v2878_v12  ;;  %v3021_v12 = vadd.f32 %v2804_v40, %v613_v47  ;;  %v1933_v9 = vmul.f32 -1.442695, %v3013_v46 }
 0x143   :  { %v2547_v27 = vpop.eup %2546  ;;  %2572 = vpow2.f32 %v1928_v11  ;;  %v1475_v62 = vmul.f32 %v2545_v22, %v2881_v17  ;;  %v3025_v17 = vadd.f32 %v2804_v40, %v741_v53  ;;  %v1901_v11 = vmul.f32 -1.442695, %v3008_v38 }
 0x144   :  { %v2549_v33 = vpop.eup %2548  ;;  %v1446_v37 = vmul.f32 %v2547_v27, %v2884_v18  ;;  %2574 = vpow2.f32 %v1894_v43  ;;  %v1899_v19 = vmul.f32 -1.442695, %v3021_v12 }
 0x145   :  { %v2551_v39 = vpop.eup %2550  ;;  %v1478_v45 = vmul.f32 %v2549_v33, %v2887_v23  ;;  %2576 = vpow2.f32 %v1926_v55 }
 0x146   :  { %v2553_v61 = vpop.eup %2552  ;;  %v2098_v57 = vpack.c.bf16 %v1446_v37, %v1445_v36  ;;  %v1444_v18 = vmul.f32 %v2551_v39, %v2890_v24  ;;  %2578 = vpow2.f32 %v1897_v21 }
 0x147   :  { %v2555_v35 = vpop.eup %2554  ;;  %v2178_v51 = vpack.c.bf16 %v1478_v45, %v1477_v41  ;;  %v1476_v5 = vmul.f32 %v2553_v61, %v2893_v28  ;;  %2580 = vpow2.f32 %v1929_v14  ;;  %v3027_v28 = vpop.f32.mrf.mxu0 }
 0x148   :  { %v2557_v23 = vpop.eup %2556  ;;  %2234 = vst [vmem:[#allocation8 + $0x28] sm:$0xff] %v2098_v57   ;;  %v2093_v4 = vpack.c.bf16 %v1444_v18, %v1443_v52  ;;  %2582 = vpow2.f32 %v1895_v25  ;;  %v1449_v21 = vmul.f32 %v2555_v35, %v2896_v29 }
 0x149   :  { %v2559_v6 = vpop.eup %2558  ;;  %2250 = vst [vmem:[#allocation8 + $0xa8] sm:$0xff] %v2178_v51   ;;  %v2173_v24 = vpack.c.bf16 %v1476_v5, %v1475_v62  ;;  %2584 = vpow2.f32 %v1927_v44  ;;  %v1481_v25 = vmul.f32 %v2557_v23, %v2900_v34  ;;  %v3039_v26 = vpop.f32.mrf.mxu0 }
 0x14a   :  { %v2561_v8 = vpop.eup %2560  ;;  %2233 = vst [vmem:[#allocation8 + $0x20] sm:$0xff] %v2093_v4   ;;  %2586 = vpow2.f32 %v1900_v56  ;;  %v1931_v56 = vmul.f32 -1.442695, %v3025_v17 }
 0x14b   :  { %v2563_v43 = vpop.eup %2562  ;;  %2249 = vst [vmem:[#allocation8 + $0xa0] sm:$0xff] %v2173_v24   ;;  %2588 = vpow2.f32 %v1932_v30  ;;  %v1447_v30 = vmul.f32 %v2559_v6, %v2911_v54  ;;  %v1479_v37 = vmul.f32 %v2561_v8, %v2914_v58 }
 0x14c   :  { %v2565_v55 = vpop.eup %2564  ;;  %v1450_v14 = vmul.f32 %v2563_v43, %v2919_v0  ;;  %2590 = vpow2.f32 %v1898_v16  ;;  %v754_v0 = vpop.f32.mrf.mxu1 }
 0x14d   :  { %v2567_v22 = vpop.eup %2566  ;;  %v1482_v44 = vmul.f32 %v2565_v55, %v2924_v7  ;;  %2592 = vpow2.f32 %v1930_v10  ;;  %v3047_v10 = vadd.f32 %v3027_v28, %v2804_v40 }
 0x14e   :  { %v2569_v27 = vpop.eup %2568  ;;  %v2108_v33 = vpack.c.bf16 %v1450_v14, %v1449_v21  ;;  %v1448_v29 = vmul.f32 %v2567_v22, %v2932_v49  ;;  %2594 = vpow2.f32 %v1901_v11  ;;  %v2344_v49 = vpop.f32.mrf.mxu0 }
 0x14f   :  { %v2571_v36 = vpop.eup %2570  ;;  %v2188_v39 = vpack.c.bf16 %v1482_v44, %v1481_v25  ;;  %v1480_v34 = vmul.f32 %v2569_v27, %v2936_v50  ;;  %2596 = vpow2.f32 %v1933_v9  ;;  %v2376_v58 = vpop.f32.mrf.mxu1  ;;  %v1904_v28 = vmul.f32 -1.442695, %v3047_v10 }
 0x150   :  { %v2573_v7 = vpop.eup %2572  ;;  %2236 = vst [vmem:[#allocation8 + $0x38] sm:$0xff] %v2108_v33   ;;  %v2103_v41 = vpack.c.bf16 %v1448_v29, %v1447_v30  ;;  %v1261_v45 = vadd.f32 1.0, %v2571_v36  ;;  %2598 = vpow2.f32 %v1899_v19  ;;  %v629_v5 = vpop.f32.mrf.mxu0  ;;  %v3051_v19 = vadd.f32 %v3030_v13, %v2804_v40 }
 0x151   :  { %v2575_v47 = vpop.eup %2574  ;;  %2252 = vst [vmem:[#allocation8 + $0xb8] sm:$0xff] %v2188_v39   ;;  %v2183_v54 = vpack.c.bf16 %v1480_v34, %v1479_v37  ;;  %v1293_v61 = vadd.f32 1.0, %v2573_v7  ;;  %2600 = vpow2.f32 %v1931_v56  ;;  %v757_v16 = vpop.f32.mrf.mxu1  ;;  %v3056_v56 = vadd.f32 %v2804_v40, %v3039_v26 }
 0x152   :  { %v2577_v52 = vpop.eup %2576  ;;  %2235 = vst [vmem:[#allocation8 + $0x30] sm:$0xff] %v2103_v41   ;;  %2602 = vrcp.f32 %v1261_v45  ;;  %v1259_v57 = vadd.f32 1.0, %v2575_v47  ;;  %v2347_v55 = vpop.f32.mrf.mxu0  ;;  %v3059_v33 = vadd.f32 %v2804_v40, %v754_v0  ;;  %v3062_v29 = vadd.f32 %v2344_v49, %v2804_v40 }
 0x153   :  { %v2579_v18 = vpop.eup %2578  ;;  %2251 = vst [vmem:[#allocation8 + $0xb0] sm:$0xff] %v2183_v54   ;;  %2604 = vrcp.f32 %v1293_v61  ;;  %v1291_v50 = vadd.f32 1.0, %v2577_v52  ;;  %v2379_v22 = vpop.f32.mrf.mxu1  ;;  %v3065_v37 = vadd.f32 %v2376_v58, %v2804_v40  ;;  %v3068_v39 = vadd.f32 %v2804_v40, %v629_v5 }
 0x154   :  { %v2581_v53 = vpop.eup %2580  ;;  %2606 = vrcp.f32 %v1259_v57  ;;  %v1262_v35 = vadd.f32 1.0, %v2579_v18  ;;  %v642_v26 = vpop.f32.mrf.mxu0  ;;  %v3071_v41 = vadd.f32 %v2804_v40, %v757_v16  ;;  %v3074_v0 = vadd.f32 %v2347_v55, %v2804_v40 }
 0x155   :  { %v2583_v62 = vpop.eup %2582  ;;  %2608 = vrcp.f32 %v1291_v50  ;;  %v1294_v51 = vadd.f32 1.0, %v2581_v53  ;;  %v770_v45 = vpop.f32.mrf.mxu1  ;;  %v1936_v61 = vmul.f32 -1.442695, %v3051_v19  ;;  %v3078_v49 = vadd.f32 %v2379_v22, %v2804_v40 }
 0x156   :  { %v2585_v23 = vpop.eup %2584  ;;  %2610 = vrcp.f32 %v1262_v35  ;;  %v1260_v4 = vadd.f32 1.0, %v2583_v62  ;;  %v1902_v57 = vmul.f32 -1.442695, %v3056_v56  ;;  %v1934_v18 = vmul.f32 -1.442695, %v3059_v33  ;;  %v2348_v35 = vpop.f32.mrf.mxu0 }
 0x157   :  { %v2587_v6 = vpop.eup %2586  ;;  %2612 = vrcp.f32 %v1294_v51  ;;  %v1292_v24 = vadd.f32 1.0, %v2585_v23  ;;  %v1905_v50 = vmul.f32 -1.442695, %v3062_v29  ;;  %v1937_v53 = vmul.f32 -1.442695, %v3065_v37 }
 0x158   :  { %v2589_v8 = vpop.eup %2588  ;;  %2614 = vrcp.f32 %v1260_v4  ;;  %v1265_v11 = vadd.f32 1.0, %v2587_v6  ;;  %v1903_v51 = vmul.f32 -1.442695, %v3068_v39  ;;  %v1935_v5 = vmul.f32 -1.442695, %v3071_v41  ;;  %v2380_v4 = vpop.f32.mrf.mxu1 }
 0x159   :  { %v2591_v43 = vpop.eup %2590  ;;  %2616 = vrcp.f32 %v1292_v24  ;;  %v1297_v9 = vadd.f32 1.0, %v2589_v8  ;;  %v1908_v23 = vmul.f32 -1.442695, %v3074_v0  ;;  %v1940_v6 = vmul.f32 -1.442695, %v3078_v49 }
 0x15a   :  { %v2593_v21 = vpop.eup %2592  ;;  %2618 = vrcp.f32 %v1265_v11  ;;  %v1263_v14 = vadd.f32 1.0, %v2591_v43  ;;  %v3089_v24 = vadd.f32 %v2804_v40, %v642_v26  ;;  %v3092_v8 = vadd.f32 %v2804_v40, %v770_v45 }
 0x15b   :  { %v2595_v25 = vpop.eup %2594  ;;  %2620 = vrcp.f32 %v1297_v9  ;;  %v1295_v44 = vadd.f32 1.0, %v2593_v21  ;;  %v3097_v55 = vadd.f32 %v2348_v35, %v2804_v40 }
 0x15c   :  { %v2597_v27 = vpop.eup %2596  ;;  %2622 = vrcp.f32 %v1263_v14  ;;  %v1266_v30 = vadd.f32 1.0, %v2595_v25  ;;  %v3102_v25 = vadd.f32 %v2380_v4, %v2804_v40 }
 0x15d   :  { %v2599_v13 = vpop.eup %2598  ;;  %2624 = vrcp.f32 %v1295_v44  ;;  %v1298_v36 = vadd.f32 1.0, %v2597_v27  ;;  %v645_v44 = vpop.f32.mrf.mxu0 }
 0x15e   :  { %v2601_v34 = vpop.eup %2600  ;;  %2626 = vrcp.f32 %v1266_v30  ;;  %v1264_v7 = vadd.f32 1.0, %v2599_v13  ;;  %v773_v30 = vpop.f32.mrf.mxu1 }
 0x15f   :  { %v2603_v47 = vpop.eup %2602  ;;  %2628 = vrcp.f32 %v1298_v36  ;;  %v1296_v54 = vadd.f32 1.0, %v2601_v34 }
 0x160   :  { %v2605_v52 = vpop.eup %2604  ;;  %2630 = vrcp.f32 %v1264_v7  ;;  %v1453_v43 = vmul.f32 %v2603_v47, %v2958_v31  ;;  %v1906_v7 = vmul.f32 -1.442695, %v3089_v24  ;;  %v1938_v47 = vmul.f32 -1.442695, %v3092_v8 }
 0x161   :  { %v2607_v58 = vpop.eup %2606  ;;  %2632 = vrcp.f32 %v1296_v54  ;;  %v1485_v14 = vmul.f32 %v2605_v52, %v2962_v42  ;;  %v1909_v54 = vmul.f32 -1.442695, %v3097_v55  ;;  %v1941_v52 = vmul.f32 -1.442695, %v3102_v25 }
 0x162   :  { %v2609_v62 = vpop.eup %2608  ;;  %2634 = vpow2.f32 %v1904_v28  ;;  %v1451_v27 = vmul.f32 %v2607_v58, %v2967_v48  ;;  %v3110_v48 = vadd.f32 %v2804_v40, %v645_v44 }
 0x163   :  { %v2611_v16 = vpop.eup %2610  ;;  %2636 = vpow2.f32 %v1936_v61  ;;  %v1483_v36 = vmul.f32 %v2609_v62, %v2970_v59  ;;  %v3114_v59 = vadd.f32 %v2804_v40, %v773_v30 }
 0x164   :  { %v2613_v11 = vpop.eup %2612  ;;  %v1454_v9 = vmul.f32 %v2611_v16, %v2973_v3  ;;  %2638 = vpow2.f32 %v1902_v57 }
 0x165   :  { %v2615_v21 = vpop.eup %2614  ;;  %v1486_v22 = vmul.f32 %v2613_v11, %v2976_v63  ;;  %2640 = vpow2.f32 %v1934_v18  ;;  %v1939_v62 = vmul.f32 -1.442695, %v3114_v59 }
 0x166   :  { %v2617_v28 = vpop.eup %2616  ;;  %v2118_v31 = vpack.c.bf16 %v1454_v9, %v1453_v43  ;;  %v1452_v3 = vmul.f32 %v2615_v21, %v2979_v1  ;;  %2642 = vpow2.f32 %v1905_v50  ;;  %v1907_v50 = vmul.f32 -1.442695, %v3110_v48 }
 0x167   :  { %v2619_v13 = vpop.eup %2618  ;;  %v2198_v26 = vpack.c.bf16 %v1486_v22, %v1485_v14  ;;  %v1484_v42 = vmul.f32 %v2617_v28, %v2982_v2  ;;  %2644 = vpow2.f32 %v1937_v53 }
 0x168   :  { %v2621_v63 = vpop.eup %2620  ;;  %2238 = vst [vmem:[#allocation8 + $0x48] sm:$0xff] %v2118_v31   ;;  %v2113_v34 = vpack.c.bf16 %v1452_v3, %v1451_v27  ;;  %2646 = vpow2.f32 %v1903_v51  ;;  %v1457_v58 = vmul.f32 %v2619_v13, %v2985_v15 }
 0x169   :  { %v2623_v45 = vpop.eup %2622  ;;  %2254 = vst [vmem:[#allocation8 + $0xc8] sm:$0xff] %v2198_v26   ;;  %v2193_v1 = vpack.c.bf16 %v1484_v42, %v1483_v36  ;;  %2648 = vpow2.f32 %v1935_v5  ;;  %v1489_v53 = vmul.f32 %v2621_v63, %v2989_v20 }
 0x16a   :  { %v2625_v2 = vpop.eup %2624  ;;  %2237 = vst [vmem:[#allocation8 + $0x40] sm:$0xff] %v2113_v34   ;;  %2650 = vpow2.f32 %v1908_v23  ;;  %v1455_v5 = vmul.f32 %v2623_v45, %v3000_v60 }
 0x16b   :  { %v2627_v61 = vpop.eup %2626  ;;  %2253 = vst [vmem:[#allocation8 + $0xc0] sm:$0xff] %v2193_v1   ;;  %2652 = vpow2.f32 %v1940_v6 }
 0x16c   :  { %v2629_v57 = vpop.eup %2628  ;;  %v1458_v18 = vmul.f32 %v2627_v61, %v3008_v38  ;;  %2654 = vpow2.f32 %v1906_v7  ;;  %v1487_v38 = vmul.f32 %v2625_v2, %v3003_v32 }
 0x16d   :  { %v2631_v40 = vpop.eup %2630  ;;  %v1490_v35 = vmul.f32 %v2629_v57, %v3013_v46  ;;  %2656 = vpow2.f32 %v1938_v47 }
 0x16e   :  { %v2633_v51 = vpop.eup %2632  ;;  %v2128_v23 = vpack.c.bf16 %v1458_v18, %v1457_v58  ;;  %v1456_v4 = vmul.f32 %v2631_v40, %v3021_v12  ;;  %2658 = vpow2.f32 %v1909_v54 }
 0x16f   :  { %v2635_v15 = vpop.eup %2634  ;;  %v2208_v16 = vpack.c.bf16 %v1490_v35, %v1489_v53  ;;  %v1488_v6 = vmul.f32 %v2633_v51, %v3025_v17  ;;  %2660 = vpow2.f32 %v1941_v52 }
 0x170   :  { %v2637_v20 = vpop.eup %2636  ;;  %2240 = vst [vmem:[#allocation8 + $0x58] sm:$0xff] %v2128_v23   ;;  %v2123_v46 = vpack.c.bf16 %v1456_v4, %v1455_v5  ;;  %v1269_v11 = vadd.f32 1.0, %v2635_v15  ;;  %2662 = vpow2.f32 %v1907_v50 }
 0x171   :  { %v2639_v43 = vpop.eup %2638  ;;  %2256 = vst [vmem:[#allocation8 + $0xd8] sm:$0xff] %v2208_v16   ;;  %v2203_v9 = vpack.c.bf16 %v1488_v6, %v1487_v38  ;;  %v1301_v60 = vadd.f32 1.0, %v2637_v20  ;;  %2664 = vpow2.f32 %v1939_v62 }
 0x172   :  { %v2641_v21 = vpop.eup %2640  ;;  %2239 = vst [vmem:[#allocation8 + $0x50] sm:$0xff] %v2123_v46   ;;  %2666 = vrcp.f32 %v1269_v11  ;;  %v1267_v12 = vadd.f32 1.0, %v2639_v43 }
 0x173   :  { %v2643_v14 = vpop.eup %2642  ;;  %2255 = vst [vmem:[#allocation8 + $0xd0] sm:$0xff] %v2203_v9   ;;  %2668 = vrcp.f32 %v1301_v60  ;;  %v1299_v32 = vadd.f32 1.0, %v2641_v21 }
 0x174   :  { %v2645_v17 = vpop.eup %2644  ;;  %2670 = vrcp.f32 %v1267_v12  ;;  %v1270_v22 = vadd.f32 1.0, %v2643_v14 }
 0x175   :  { %v2647_v44 = vpop.eup %2646  ;;  %2672 = vrcp.f32 %v1299_v32  ;;  %v1302_v28 = vadd.f32 1.0, %v2645_v17 }
 0x176   :  { %v2649_v27 = vpop.eup %2648  ;;  %2674 = vrcp.f32 %v1270_v22  ;;  %v1268_v31 = vadd.f32 1.0, %v2647_v44 }
 0x177   :  { %v2651_v3 = vpop.eup %2650  ;;  %2676 = vrcp.f32 %v1302_v28  ;;  %v1300_v30 = vadd.f32 1.0, %v2649_v27 }
 0x178   :  { %v2653_v13 = vpop.eup %2652  ;;  %2678 = vrcp.f32 %v1268_v31  ;;  %v1273_v36 = vadd.f32 1.0, %v2651_v3 }
 0x179   :  { %v2655_v26 = vpop.eup %2654  ;;  %2680 = vrcp.f32 %v1300_v30  ;;  %v1305_v42 = vadd.f32 1.0, %v2653_v13 }
 0x17a   :  { %v2657_v63 = vpop.eup %2656  ;;  %2682 = vrcp.f32 %v1273_v36  ;;  %v1271_v34 = vadd.f32 1.0, %v2655_v26 }
 0x17b   :  { %v2659_v7 = vpop.eup %2658  ;;  %2684 = vrcp.f32 %v1305_v42  ;;  %v1303_v45 = vadd.f32 1.0, %v2657_v63 }
 0x17c   :  { %v2661_v1 = vpop.eup %2660  ;;  %2686 = vrcp.f32 %v1271_v34  ;;  %v1274_v47 = vadd.f32 1.0, %v2659_v7 }
 0x17d   :  { %v2663_v2 = vpop.eup %2662  ;;  %2688 = vrcp.f32 %v1303_v45  ;;  %v1306_v54 = vadd.f32 1.0, %v2661_v1 }
 0x17e   :  { %v2665_v61 = vpop.eup %2664  ;;  %2690 = vrcp.f32 %v1274_v47  ;;  %v1272_v52 = vadd.f32 1.0, %v2663_v2 }
 0x17f   :  { %v2667_v57 = vpop.eup %2666  ;;  %2692 = vrcp.f32 %v1306_v54  ;;  %v1304_v58 = vadd.f32 1.0, %v2665_v61 }
 0x180   :  { %v2669_v18 = vpop.eup %2668  ;;  %2694 = vrcp.f32 %v1272_v52  ;;  %v1461_v62 = vmul.f32 %v2667_v57, %v3047_v10 }
 0x181   :  { %v2671_v50 = vpop.eup %2670  ;;  %2696 = vrcp.f32 %v1304_v58  ;;  %v1493_v23 = vmul.f32 %v2669_v18, %v3051_v19 }
 0x182   :  { %v2673_v40 = vpop.eup %2672  ;;  %v1459_v38 = vmul.f32 %v2671_v50, %v3056_v56 }
 0x183   :  { %v2675_v53 = vpop.eup %2674  ;;  %v1491_v46 = vmul.f32 %v2673_v40, %v3059_v33 }
 0x184   :  { %v2677_v35 = vpop.eup %2676  ;;  %v1462_v51 = vmul.f32 %v2675_v53, %v3062_v29 }
 0x185   :  { %v2679_v5 = vpop.eup %2678  ;;  %v1494_v4 = vmul.f32 %v2677_v35, %v3065_v37 }
 0x186   :  { %v2681_v15 = vpop.eup %2680  ;;  %v2138_v16 = vpack.c.bf16 %v1462_v51, %v1461_v62  ;;  %v1460_v6 = vmul.f32 %v2679_v5, %v3068_v39 }
 0x187   :  { %v2683_v20 = vpop.eup %2682  ;;  %v2218_v11 = vpack.c.bf16 %v1494_v4, %v1493_v23  ;;  %v1492_v43 = vmul.f32 %v2681_v15, %v3071_v41 }
 0x188   :  { %v2685_v10 = vpop.eup %2684  ;;  %2242 = vst [vmem:[#allocation8 + $0x68] sm:$0xff] %v2138_v16   ;;  %v2133_v29 = vpack.c.bf16 %v1460_v6, %v1459_v38  ;;  %v1465_v21 = vmul.f32 %v2683_v20, %v3074_v0 }
 0x189   :  { %v2687_v9 = vpop.eup %2686  ;;  %2258 = vst [vmem:[#allocation8 + $0xe8] sm:$0xff] %v2218_v11   ;;  %v2213_v19 = vpack.c.bf16 %v1492_v43, %v1491_v46  ;;  %v1497_v33 = vmul.f32 %v2685_v10, %v3078_v49 }
 0x18a   :  { %v2689_v60 = vpop.eup %2688  ;;  %2241 = vst [vmem:[#allocation8 + $0x60] sm:$0xff] %v2133_v29   ;;  %v1463_v32 = vmul.f32 %v2687_v9, %v3089_v24 }
 0x18b   :  { %v2691_v37 = vpop.eup %2690  ;;  %2257 = vst [vmem:[#allocation8 + $0xe0] sm:$0xff] %v2213_v19   ;;  %v1495_v44 = vmul.f32 %v2689_v60, %v3092_v8 }
 0x18c   :  { %v2693_v56 = vpop.eup %2692  ;;  %v1466_v39 = vmul.f32 %v2691_v37, %v3097_v55 }
 0x18d   :  { %v2695_v12 = vpop.eup %2694  ;;  %v1498_v41 = vmul.f32 %v2693_v56, %v3102_v25 }
 0x18e   :  { %v2697_v14 = vpop.eup %2696  ;;  %v2148_v17 = vpack.c.bf16 %v1466_v39, %v1465_v21  ;;  %v1464_v22 = vmul.f32 %v2695_v12, %v3110_v48 }
 0x18f   :  { %v2228_v28 = vpack.c.bf16 %v1498_v41, %v1497_v33  ;;  %v1496_v0 = vmul.f32 %v2697_v14, %v3114_v59 }
 0x190   :  { %2244 = vst [vmem:[#allocation8 + $0x78] sm:$0xff] %v2148_v17   ;;  %v2143_v55 = vpack.c.bf16 %v1464_v22, %v1463_v32 }
 0x191   :  { %2260 = vst [vmem:[#allocation8 + $0xf8] sm:$0xff] %v2228_v28   ;;  %v2223_v27 = vpack.c.bf16 %v1496_v0, %v1495_v44 }
 0x192   :  { %2243 = vst [vmem:[#allocation8 + $0x70] sm:$0xff] %v2143_v55  }
 0x193   :  { %2259 = vst [vmem:[#allocation8 + $0xf0] sm:$0xff] %v2223_v27  }
 0x194   :  { %2749 = shalt.err (!%p2746_p0)
}
 0x195   :  { %1830 = dma.vmem_to_hbm [thread:$0]  %s1825_s24, 4096, %s3153_s3, [#allocation5], %s2765_s15, %s2765_s15, %s2766_s16  }
 0x196   :  { %2762 = dma.done.wait [#allocation5], 4096  }
 0x197   :  { %2763 = vsyncadd [#allocation5], 4294963200 }
 0x198   :  { %1834 = vsyncpa [#allocation4], 1 }
 0x199   :  { %1835 = vsyncpa [#allocation7], 1 }
 0x19a   :  { %1836 = vsyncpa [#allocation5], 1 }

</bundles_post_ra>
